<compile_context>
chip_gen: v7x
topology: tpu7x:2x2x1
jax: 0.10.0
libtpu: 0.0.40
codegen_flags: <defaults>
</compile_context>

<pallas_src>
import jax
import jax.numpy as jnp
from jax.experimental import pallas as pl
from jax.experimental.pallas import tpu as pltpu

_LANES = 128


def _relu_kernel(x_ref, y_ref, mask_ref):
    x = x_ref[...]
    one = jnp.ones((), dtype=x.dtype)
    zero = jnp.zeros((), dtype=x.dtype)
    mask = jnp.where(x > 0, one, zero)   # VPU cmp + select
    y_ref[...] = x * mask                # keeps NaN * 0 = NaN semantics
    mask_ref[...] = mask


def _vmem_budget_bytes() -> int:
    """Scoped-VMEM budget for the 6 live tiles (1 input + 2 outputs, double
    buffered).

    v6e / v7x: 24 MiB (scoped limit is raised to 32 MiB explicitly; v7x has
    only 64 MiB physical VMEM per TensorCore, so do not go higher).
    v5e / unknown: conservative 12 MiB (v5e's default scoped limit is 16 MiB).
    """
    try:
        kind = jax.devices()[0].device_kind.lower()
    except Exception:
        return 12 * 1024 * 1024
    if ("v6" in kind) or ("v7" in kind):
        return 24 * 1024 * 1024
    return 12 * 1024 * 1024


def _relu_slab(x2d: jax.Array, *, block_rows: int):
    """Runs the kernel on a lane-dense (rows, 128) slab."""
    rows, lanes = x2d.shape
    dtype = x2d.dtype
    itemsize = jnp.dtype(dtype).itemsize
    # Sublane packing multiple: 8 (4-byte), 16 (2-byte), 32 (1-byte dtypes).
    sub = max(8, 32 // itemsize)

    budget = _vmem_budget_bytes()
    # 6 live tiles: (1 input + 2 outputs) x default double buffering.
    cap = max(sub, budget // (6 * lanes * itemsize))
    tm = min(block_rows, cap, ((rows + sub - 1) // sub) * sub)
    tm = max(sub, (tm // sub) * sub)

    # Guarantee >= 2 grid steps whenever rows allow it, so v7x's two
    # TensorCores both get work under dimension_semantics=("parallel",).
    # On single-TC chips this costs at most one extra ~0.35 us grid step.
    if rows > sub and pl.cdiv(rows, tm) < 2:
        tm = ((pl.cdiv(rows, 2) + sub - 1) // sub) * sub

    grid = (pl.cdiv(rows, tm),)  # partial last block handled by Pallas clipping
    spec = pl.BlockSpec((tm, lanes), lambda i: (i, 0))

    n = rows * lanes
    cost = pl.CostEstimate(
        flops=2 * n,                       # compare + multiply per element
        transcendentals=0,
        bytes_accessed=3 * n * itemsize,   # read x, write y and mask
    )

    # Only raise the scoped limit when we actually use the bigger budget.
    vmem_limit = (32 * 1024 * 1024) if budget > 12 * 1024 * 1024 else None

    return pl.pallas_call(
        _relu_kernel,
        out_shape=(
            jax.ShapeDtypeStruct((rows, lanes), dtype),
            jax.ShapeDtypeStruct((rows, lanes), dtype),
        ),
        grid_spec=pltpu.PrefetchScalarGridSpec(
            num_scalar_prefetch=0,
            grid=grid,
            in_specs=[spec],
            out_specs=[spec, spec],
        ),
        compiler_params=pltpu.CompilerParams(
            dimension_semantics=("parallel",),
            vmem_limit_bytes=vmem_limit,
        ),
        cost_estimate=cost,
    )(x2d)


def relu_with_mask(x: jax.Array, *, block_rows: int = 8192):
    """Returns (x * mask, mask) with mask = (x > 0).astype(x.dtype)."""
    orig_shape = x.shape
    dtype = x.dtype
    total = x.size

    rem = total % _LANES
    aligned = total - rem

    if aligned == 0:
        # Fewer than 128 elements (or empty): a kernel launch would be pure
        # overhead; plain XLA elementwise already sits at roofline here.
        mask = (x > 0).astype(dtype)
        return x * mask, mask

    x_flat = x.reshape(-1)

    if rem == 0:
        # Common case: no pad, no slices — zero extra HBM traffic.
        x2d = x_flat.reshape(total // _LANES, _LANES)
        y2d, m2d = _relu_slab(x2d, block_rows=block_rows)
        return y2d.reshape(orig_shape), m2d.reshape(orig_shape)

    # Unaligned total: kernel on the 128-aligned prefix, trivial jnp on the
    # <128-element tail, then stitch. The stitch still copies the outputs
    # once, but this rare branch no longer pays the full pad + two un-pad
    # passes of the previous version.
    head = x_flat[:aligned].reshape(aligned // _LANES, _LANES)
    y_head, m_head = _relu_slab(head, block_rows=block_rows)

    tail = x_flat[aligned:]
    tail_mask = (tail > 0).astype(dtype)
    tail_y = tail * tail_mask

    y = jnp.concatenate([y_head.reshape(-1), tail_y]).reshape(orig_shape)
    m = jnp.concatenate([m_head.reshape(-1), tail_mask]).reshape(orig_shape)
    return y, m


if __name__ == "__main__":
    key = jax.random.PRNGKey(0)
    # NCHW input, small shape consistent with a conv-style flow module.
    x = jax.random.normal(key, (2, 4, 16, 16), dtype=jnp.float32)

    y, mask = relu_with_mask(x)
    jax.block_until_ready((y, mask))

    # Reference check against plain JAX semantics of the PyTorch module.
    ref_mask = (x > 0).astype(x.dtype)
    ref_y = x * ref_mask
    assert y.shape == x.shape and mask.shape == x.shape
    assert y.dtype == x.dtype and mask.dtype == x.dtype
    assert jnp.array_equal(y, ref_y)
    assert jnp.array_equal(mask, ref_mask)

    print("KERNEL_OK")
</pallas_src>

<mosaic_0001>
module attributes {stable_mosaic.version = 11 : i64} {
  func.func @_relu_kernel(%arg0: i32, %arg1: memref<8x128xf32, #tpu.memory_space<vmem>>, %arg2: memref<8x128xf32, #tpu.memory_space<vmem>>, %arg3: memref<8x128xf32, #tpu.memory_space<vmem>>) attributes {dimension_semantics = [#tpu.dimension_semantics<parallel>], iteration_bounds = array<i64: 2>, scalar_prefetch = 0 : i64, scratch_operands = 0 : i64, tpu.core_type = #tpu.core_type<tc>, window_params = [{transform_indices = @transform_0, window_bounds = array<i64: 8, 128>}, {transform_indices = @transform_1, window_bounds = array<i64: 8, 128>}, {transform_indices = @transform_2, window_bounds = array<i64: 8, 128>}]} {
    %c0 = arith.constant 0 : index
    %c0_0 = arith.constant 0 : index
    %0 = vector.load %arg1[%c0, %c0_0] : memref<8x128xf32, #tpu.memory_space<vmem>>, vector<8x128xf32>
    %cst = arith.constant 0.000000e+00 : f32
    %1 = vector.broadcast %cst : f32 to vector<8x128xf32>
    %2 = arith.cmpf ogt, %0, %1 : vector<8x128xf32>
    %cst_1 = arith.constant 1.000000e+00 : f32
    %cst_2 = arith.constant 0.000000e+00 : f32
    %3 = vector.broadcast %cst_1 : f32 to vector<8x128xf32>
    %4 = vector.broadcast %cst_2 : f32 to vector<8x128xf32>
    %5 = arith.select %2, %3, %4 : vector<8x128xi1>, vector<8x128xf32>
    %6 = arith.mulf %0, %5 : vector<8x128xf32>
    %c0_3 = arith.constant 0 : index
    %c0_4 = arith.constant 0 : index
    %7 = vector.load %arg2[%c0_3, %c0_4] : memref<8x128xf32, #tpu.memory_space<vmem>>, vector<8x128xf32>
    tpu.vector_store %arg2[%c0_3, %c0_4], %6 {strides = array<i32>} : memref<8x128xf32, #tpu.memory_space<vmem>>, vector<8x128xf32>,
    %c0_5 = arith.constant 0 : index
    %c0_6 = arith.constant 0 : index
    %8 = vector.load %arg3[%c0_5, %c0_6] : memref<8x128xf32, #tpu.memory_space<vmem>>, vector<8x128xf32>
    tpu.vector_store %arg3[%c0_5, %c0_6], %5 {strides = array<i32>} : memref<8x128xf32, #tpu.memory_space<vmem>>, vector<8x128xf32>,
    return
  }
  func.func @transform_0(%arg0: i32) -> (i32, i32) {
    %c0_i32 = arith.constant 0 : i32
    %c0_i32_0 = arith.constant 0 : i32
    return %arg0, %c0_i32 : i32, i32
  }
  func.func @transform_1(%arg0: i32) -> (i32, i32) {
    %c0_i32 = arith.constant 0 : i32
    %c0_i32_0 = arith.constant 0 : i32
    return %arg0, %c0_i32 : i32, i32
  }
  func.func @transform_2(%arg0: i32) -> (i32, i32) {
    %c0_i32 = arith.constant 0 : i32
    %c0_i32_0 = arith.constant 0 : i32
    return %arg0, %c0_i32 : i32, i32
  }
}

</mosaic_0001>

<bundles_post_ra>
// kernel: tpu_custom_call.1
= control target key start
LH: loop header
LB: loop body
LE: loop exit
PB: predicated region body
PF: predicated region fallthrough
CT: control target
= control target key end

     0   :  { %8 = vsyncpa [#allocation3], 0  ;;  %s725_s0 = inlined_call_operand.hbm [shape: f32[16,128], index: 0, kind: input, shape index: {}]   ;;  %s726_s1 = inlined_call_operand.hbm [shape: f32[16,128], index: 1, kind: output, shape index: {0}]   ;;  %s727_s2 = inlined_call_operand.hbm [shape: f32[16,128], index: 2, kind: output, shape index: {1}]  }
   0x1   :  { %10 = vsyncpa [#allocation3 + $0x1], 0 }
   0x2   :  { %11 = vsyncpa [#allocation4], 0 }
   0x3   :  { %13 = vsyncpa [#allocation4 + $0x1], 0 }
   0x4   :  { %14 = vsyncpa [#allocation7], 0 }
   0x5   :  { %16 = vsyncpa [#allocation7 + $0x1], 0  ;;  %s526_s9 = smov 0   ;;  %s528_s10 = smov 0  }
   0x6   :  { %s530_s11 = smov 0   ;;  %s532_s12 = smov 0  }
   0x7 LB: > { %s547_s13 = sadd.s32 4294967295, %s505_s12   ;;  %s310_s14 = sadd.s32 4294967294, %s505_s12   ;;  %s505_s12 = sphi %s532_s12, %s742_s12   ;;  %s501_s11 = sphi %s530_s11, %s741_s11   ;;  %s497_s10 = sphi %s528_s10, %s740_s10   ;;  %s493_s9 = sphi %s526_s9, %s739_s9  }
   0x8   : > { %s551_s15 = sadd.s32 1, %s505_s12   ;;  %s29_s16 = sadd.s32 1, %s501_s11 }
   0x9   : > { %s26_s17 = ssub.s32 %s505_s12, %s551_s15  ;;  %p36_p0 = scmp.ne.s32.totalorder %s501_s11, %s497_s10 }
   0xa   : > { %p27_p1 = scmp.eq.s32.totalorder %s26_s17, 0  ;;  %p37_p2 = scmp.eq.s32.totalorder %s505_s12, 0 }
   0xb   : > { %p42_p3 = scmp.ne.s32.totalorder %s497_s10, %s493_s9  ;;  %p43_p4 = scmp.eq.s32.totalorder %s547_s13, 0 }
   0xc   : > { %s563_s18 = scalar_select %p27_p1, %s501_s11, %s29_s16  }
   0xd   : > { %p565_p5 = por %p37_p2, %p36_p0  ;;  %p569_p6 = por %p43_p4, %p42_p3 }
   0xe   : > { %p66_p7 = scmp.eq.s32.totalorder %s547_s13, 1  ;;  %p72_p8 = scmp.eq.s32.totalorder %s310_s14, 1 }
   0xf   : > { %p342_p10 = scmp.lt.s32.totalorder %s505_s12, 2  ;;  %s118_s23 = sand.u32 1, %s501_s11  }
  0x10   : > { %p576_p11 = por %p66_p7, %p36_p0  ;;  %p580_p12 = por %p72_p8, %p42_p3 }
  0x11   : > { %s314_s24 = sshll.u32 %s505_s12, 7  ;;  %s313_s25 = sshll.u32 %s118_s23, 3 }
  0x12   : > { %s731_s21 = scalar_select %p576_p11, 1, 0 }
  0x13   : > { %s732_s22 = scalar_select %p580_p12, 1, 0 }
  0x14   : > { %s589_s28 = scalar_lea.hbm %s725_s0, %s314_s24  ;;  %s122_s29 = scalar_lea.vmem [#allocation2], %s313_s25 }
  0x15   : > { %s129_s30 = sshll.u32 %s122_s29, 4  ;;  %p593_p13 = pnand %p342_p10, %p565_p5  ;;  %s597_s30 = int_to_ptr.vmem [resolvable:$true] %s129_s30 }
  0x16   : > { %s119_s4 = scalar_lea.sflag [#allocation3], %s118_s23  ;;  %s377_s5 = scalar_lea.hbm %s589_s28, 128 }
  0x17   : > { %p378_p2 = scmp.ne.s32.totalorder %s589_s28, %s377_s5  ;;  %p379_p3 = pneg %p593_p13 }
  0x18   : > { %s382_s8 = scalar_lea.hbm %s725_s0, 256  ;;  %p383_p5 = scmp.lt.u32.totalorder %s589_s28, %s725_s0 }
  0x19   : > { %p380_p4 = pnand %p379_p3, %p378_p2  ;;  %p384_p8 = scmp.lt.u32.totalorder %s382_s8, %s377_s5 }
  0x1a   : > { %p386_p9 = scmp.lt.u32.totalorder %s377_s5, %s589_s28 }
  0x1b   : > { %p381_p7 = pneg %p380_p4  ;;  %p385_p10 = por %p384_p8, %p383_p5 }
  0x1d   : > { %p387_p0 = por %p386_p9, %p385_p10 }
  0x1f   : > { %p388_p1 = pnand %p387_p0, %p381_p7 }
  0x21   : > { %391 = shalt.err (!%p388_p1)
}
  0x22   : > { %s392_s17 = scalar_lea.vmem %s597_s30, 128  ;;  %s507_s19 = smov [#allocation2]  }
  0x23   : > { %p393_p2 = scmp.ne.s32.totalorder %s597_s30, %s392_s17  ;;  %s397_s23 = sshll.u32 %s507_s19, 4  ;;  %s398_s23 = int_to_ptr.vmem [resolvable:$false] %s397_s23 }
  0x24   : > { %s399_s24 = scalar_lea.vmem %s398_s23, 256  ;;  %p400_p11 = scmp.lt.s32.totalorder %s597_s30, %s398_s23 }
  0x25   : > { %p395_p4 = pnand %p393_p2, %p379_p3  ;;  %p401_p5 = scmp.lt.s32.totalorder %s399_s24, %s392_s17 }
  0x27   : > { %p396_p12 = pneg %p395_p4  ;;  %p402_p8 = por %p401_p5, %p400_p11 }
  0x29   : > { %p403_p9 = pnand %p402_p8, %p396_p12 }
  0x2b   : > { %406 = shalt.err (!%p403_p9)
}
  0x2c   : > { %334 = dma.hbm_to_vmem [thread:$0]  (!%p593_p13), %s589_s28, 128, %s597_s30, %s119_s4  }
  0x2d   : > { %p734_p0 = scmp.lt.s32.totalorder %s505_s12, 3  ;;  %p735_p1 = scmp.ge.s32.totalorder %s505_s12, 1 }
  0x2f   : > { %p135_p3 = pnand %p735_p1, %p734_p0 }
  0x30   : > { %s631_s25 = sand.u32 (!%p135_p3), 1, %s497_s10  }
  0x31   : > { %138 = sbr.rel (%p135_p3) target bundleno = 107 (0x6b), region = 24  ;;  %s634_s26 = sshll.u32 (!%p135_p3), %s631_s25, 3 }
  0x32   : > { %s141_s27 = scalar_lea.sflag (!%p135_p3), [#allocation3], %s631_s25  ;;  %s144_s29 = scalar_lea.vmem (!%p135_p3), [#allocation2], %s634_s26 }
  0x38   : > { %480 = dma.done.wait (%p569_p6), %s141_s27, 128  }
  0x39   : > { %482 = vsyncadd (%p569_p6), %s141_s27, 4294967168  ;;  %s169_s28 = scalar_lea.vmem [#allocation6], %s634_s26  ;;  %s321_s3 = sshll.u32 %s547_s13, 7  ;;  %v170_v0 = vld [vmem:[%s144_s29] sm:$0xff]  ;;  %v508_v1 = vmov 0.0  }
  0x3a   : > { %s208_s30 = sshll.u32 %s169_s28, 4  ;;  %s162_s4 = scalar_lea.vmem [#allocation5], %s634_s26  ;;  %vm171_vm0 = vcmp.gt.f32.partialorder %v170_v0, 0.0  ;;  %s647_s30 = int_to_ptr.vmem [resolvable:$true] %s208_s30 }
  0x3b   : > { %s195_s5 = sshll.u32 %s162_s4, 4  ;;  %s652_s7 = scalar_lea.hbm %s727_s2, %s321_s3  ;;  %v172_v2 = vsel %vm171_vm0, 1.0, %v508_v1  ;;  %s654_s5 = int_to_ptr.vmem [resolvable:$true] %s195_s5 }
  0x3c   : > { %v173_v3 = vmul.f32 %v172_v2, %v170_v0  ;;  %175 = vst [vmem:[%s169_s28] sm:$0xff] %v172_v2  ;;  %s659_s14 = scalar_lea.hbm %s726_s1, %s321_s3  ;;  %s182_s16 = scalar_lea.sflag [#allocation7], %s631_s25 }
  0x3d   : > { %s407_s17 = scalar_lea.vmem %s647_s30, 128  ;;  %p736_p11 = scmp.ne.s32.totalorder %s731_s21, 0 }
  0x3e   : > { %p408_p6 = scmp.ne.s32.totalorder %s647_s30, %s407_s17  ;;  %s509_s19 = smov [#allocation6]  }
  0x3f   : > { %s411_s23 = sshll.u32 %s509_s19, 4  ;;  %s412_s23 = int_to_ptr.vmem [resolvable:$false] %s411_s23 }
  0x40   : > { %p409_p12 = pnand %p408_p6, %p736_p11  ;;  %s413_s24 = scalar_lea.vmem %s412_s23, 256 }
  0x41   : > { %p414_p7 = scmp.lt.s32.totalorder %s647_s30, %s412_s23  ;;  %p415_p10 = scmp.lt.s32.totalorder %s413_s24, %s407_s17 }
  0x42   : > { %p410_p13 = pneg %p409_p12 }
  0x43   : > { %p416_p2 = por %p415_p10, %p414_p7 }
  0x45   : > { %p417_p4 = pnand %p416_p2, %p410_p13 }
  0x47   : > { %420 = shalt.err (!%p417_p4)
}
  0x48   : > { %s421_s27 = scalar_lea.hbm %s652_s7, 128  ;;  %s425_s3 = scalar_lea.hbm %s727_s2, 256 }
  0x49   : > { %p422_p5 = scmp.ne.s32.totalorder %s652_s7, %s421_s27  ;;  %p426_p0 = scmp.lt.u32.totalorder %s652_s7, %s727_s2 }
  0x4a   : > { %p427_p1 = scmp.lt.u32.totalorder %s425_s3, %s421_s27  ;;  %p429_p6 = scmp.lt.u32.totalorder %s421_s27, %s652_s7 }
  0x4b   : > { %p423_p8 = pnand %p422_p5, %p736_p11 }
  0x4c   : > { %p428_p3 = por %p427_p1, %p426_p0 }
  0x4d   : > { %p424_p9 = pneg %p423_p8 }
  0x4e   : > { %p430_p12 = por %p429_p6, %p428_p3 }
  0x50   : > { %p431_p13 = pnand %p430_p12, %p424_p9 }
  0x52   : > { %434 = shalt.err (!%p431_p13)
}
  0x53   : > { %328 = dma.vmem_to_hbm [thread:$0]  (%p736_p11), %s647_s30, 128, %s652_s7, %s182_s16   ;;  %174 = vst [vmem:[%s162_s4] sm:$0xff] %v173_v3 }
  0x54   : > { %s177_s13 = scalar_lea.sflag [#allocation4], %s631_s25  ;;  %s435_s8 = scalar_lea.vmem %s654_s5, 128 }
  0x55   : > { %p436_p7 = scmp.ne.s32.totalorder %s654_s5, %s435_s8  ;;  %s510_s17 = smov [#allocation5]  }
  0x56   : > { %s439_s19 = sshll.u32 %s510_s17, 4  ;;  %s440_s19 = int_to_ptr.vmem [resolvable:$false] %s439_s19 }
  0x57   : > { %p437_p10 = pnand %p436_p7, %p736_p11  ;;  %s441_s23 = scalar_lea.vmem %s440_s19, 256 }
  0x58   : > { %p442_p4 = scmp.lt.s32.totalorder %s654_s5, %s440_s19  ;;  %p443_p5 = scmp.lt.s32.totalorder %s441_s23, %s435_s8 }
  0x59   : > { %p438_p2 = pneg %p437_p10 }
  0x5a   : > { %p444_p8 = por %p443_p5, %p442_p4 }
  0x5c   : > { %p445_p9 = pnand %p444_p8, %p438_p2 }
  0x5e   : > { %448 = shalt.err (!%p445_p9)
}
  0x5f   : > { %s449_s25 = scalar_lea.hbm %s659_s14, 128  ;;  %s453_s4 = scalar_lea.hbm %s726_s1, 256 }
  0x60   : > { %p450_p0 = scmp.ne.s32.totalorder %s659_s14, %s449_s25  ;;  %p454_p6 = scmp.lt.u32.totalorder %s659_s14, %s726_s1 }
  0x61   : > { %p455_p12 = scmp.lt.u32.totalorder %s453_s4, %s449_s25  ;;  %p457_p7 = scmp.lt.u32.totalorder %s449_s25, %s659_s14 }
  0x62   : > { %p451_p1 = pnand %p450_p0, %p736_p11 }
  0x63   : > { %p456_p13 = por %p455_p12, %p454_p6 }
  0x64   : > { %p452_p3 = pneg %p451_p1 }
  0x65   : > { %p458_p10 = por %p457_p7, %p456_p13 }
  0x67   : > { %p459_p2 = pnand %p458_p10, %p452_p3 }
  0x69   : > { %462 = shalt.err (!%p459_p2)
}
  0x6a   : > { %327 = dma.vmem_to_hbm [thread:$0]  (%p736_p11), %s654_s5, 128, %s659_s14, %s177_s13  }
  0x6b PF: > { %s220_s24 = sand.u32 1, %s493_s9   ;;  %p737_p4 = scmp.ne.s32.totalorder %s732_s22, 0 }
  0x6c   : > { %p738_p5 = scmp.ge.s32.totalorder %s505_s12, 2  ;;  %s221_s27 = scalar_lea.sflag [#allocation4], %s220_s24 }
  0x6e   : > { %p336_p8 = pnand %p738_p5, %p737_p4 }
  0x70   : > { %484 = dma.done.wait (!%p336_p8), %s221_s27, 128  }
  0x71   : > { %486 = vsyncadd (!%p336_p8), %s221_s27, 4294967168  ;;  %s230_s29 = scalar_lea.sflag [#allocation7], %s220_s24 }
  0x72   : > { %488 = dma.done.wait (!%p336_p8), %s230_s29, 128  }
  0x73   : > { %490 = vsyncadd (!%p336_p8), %s230_s29, 4294967168  ;;  %p19_p11 = scmp.ge.s32.totalorder %s551_s15, 4   ;;  %s739_s9 = smov %s497_s10 }
  0x74   : > { %s740_s10 = smov %s501_s11  ;;  %s741_s11 = smov %s563_s18 }
  0x75   : > { %s742_s12 = smov %s551_s15  ;;  %21 = sbr.rel (!%p19_p11) target bundleno = 7 (0x7), region = 86 }
  0x7c   :  { %235 = vsyncpa [#allocation3], 1 }
  0x7d   :  { %237 = vsyncpa [#allocation3 + $0x1], 1 }
  0x7e   :  { %238 = vsyncpa [#allocation4], 1 }
  0x7f   :  { %240 = vsyncpa [#allocation4 + $0x1], 1 }
  0x80   :  { %241 = vsyncpa [#allocation7], 1 }
  0x81   :  { %243 = vsyncpa [#allocation7 + $0x1], 1 }

</bundles_post_ra>
